<compile_context>
chip_gen: v7x
topology: tpu7x:2x2x1
jax: 0.10.0
libtpu: 0.0.40
codegen_flags: <defaults>
</compile_context>

<pallas_src>
import functools

import jax
import jax.numpy as jnp
from jax.experimental import pallas as pl
from jax.experimental.pallas import tpu as pltpu


@functools.lru_cache(maxsize=None)
def _tensorcores_per_chip() -> int:
    """Best-effort: 2 TensorCores per chip on TPU v7x, 1 on v5e/v6e."""
    try:
        kind = jax.devices()[0].device_kind.lower()
    except Exception:
        return 1
    return 2 if "v7" in kind else 1


def _pw_conv_phase_max_kernel(x_ref, w_ref, b_ref, o_ref, *, nb, kk, L):
    """Pointwise (1x1) conv as one streamed matmul + max over pooling phases.

    x_ref: (1, C_in, nb*kk*L)   lanes = [batch | phase | spatial], each L-slice
                                lane-aligned (L is a multiple of 128 here)
    w_ref: (C_out, C_in)        1x1 conv weights
    b_ref: (C_out, 1)           bias (f32, added after the phase max)
    o_ref: (1, nb, C_out, L)    lane-dense output block
    """
    w = w_ref[...]
    b = b_ref[...]
    # Single MXU push over all batches and pooling phases in this block.
    acc = jnp.dot(w, x_ref[0], preferred_element_type=jnp.float32)
    for n in range(nb):                       # static -> unrolled
        base = n * kk * L
        r = acc[:, base:base + L]
        for p in range(1, kk):                # static, lane-aligned slices (VPU)
            r = jnp.maximum(r, acc[:, base + p * L:base + (p + 1) * L])
        o_ref[0, n] = (r + b).astype(o_ref.dtype)


@functools.partial(jax.jit, static_argnames=("pool_k", "out_size", "compute_dtype"))
def simple_align_pallas(x_nchw, w_oihw, bias, *, pool_k, out_size,
                        compute_dtype=jnp.float32):
    """PyTorch-semantics simple_align forward (NCHW in / NCHW out)."""
    N, C_in, H, W = x_nchw.shape
    C_out = w_oihw.shape[0]
    th, tw = out_size

    # One grid step on single-TC chips (v5e/v6e); one batch per step on v7x.
    G = N if (_tensorcores_per_chip() > 1 and N > 1) else 1
    NB = N // G

    if pool_k >= 2:
        # MaxPool2d(kernel_size=pool_k, stride=pool_k): floor-crop (PyTorch
        # semantics) + space-to-depth into kk phase planes on the lane axis.
        # Valid because a 1x1 conv is pointwise:
        #   maxpool(conv(x)) = max_p conv(x_phase_p).
        H2, W2 = H // pool_k, W // pool_k
        kk = pool_k * pool_k
        L = H2 * W2
        xc = x_nchw[:, :, :H2 * pool_k, :W2 * pool_k]
        xp = xc.reshape(G, NB, C_in, H2, pool_k, W2, pool_k)
        xp = xp.transpose(0, 2, 1, 4, 6, 3, 5)        # (G,Cin,NB,kh,kw,H2,W2)
        xp = xp.reshape(G, C_in, NB * kk * L)
    else:
        # nn.Upsample(size, mode='nearest'): src = floor(dst*in/out).  The
        # gather commutes with the 1x1 conv, so gather the INPUT to output
        # resolution -> kernel output is lane-dense and no post-kernel gather.
        H2, W2 = th, tw
        kk = 1
        L = th * tw
        ridx = (jnp.arange(th) * H) // th
        cidx = (jnp.arange(tw) * W) // tw
        xg = x_nchw[:, :, ridx][:, :, :, cidx]        # (N, Cin, th, tw)
        xp = xg.reshape(G, NB, C_in, th, tw).transpose(0, 2, 1, 3, 4)
        xp = xp.reshape(G, C_in, NB * L)

    xp = xp.astype(compute_dtype)
    w2d = w_oihw.reshape(C_out, C_in).astype(compute_dtype)
    b2d = bias.reshape(C_out, 1).astype(jnp.float32)   # bias stays f32

    kernel = functools.partial(_pw_conv_phase_max_kernel, nb=NB, kk=kk, L=L)

    out = pl.pallas_call(
        kernel,
        out_shape=jax.ShapeDtypeStruct((G, NB, C_out, L), x_nchw.dtype),
        grid_spec=pltpu.PrefetchScalarGridSpec(
            num_scalar_prefetch=0,
            grid=(G,),
            in_specs=[
                pl.BlockSpec((1, C_in, NB * kk * L), lambda g: (g, 0, 0)),
                pl.BlockSpec((C_out, C_in), lambda g: (0, 0)),
                pl.BlockSpec((C_out, 1), lambda g: (0, 0)),
            ],
            out_specs=pl.BlockSpec((1, NB, C_out, L), lambda g: (g, 0, 0, 0)),
        ),
        compiler_params=pltpu.CompilerParams(
            dimension_semantics=("parallel",)),
    )(xp, w2d, b2d)

    # Contiguous (free) reshape back to NCHW.
    return out.reshape(N, C_out, H2, W2)


class CompressorPallas:
    """JAX/Pallas re-implementation of compressor (simple_align)."""

    def __init__(self, args, key, compute_dtype=jnp.float32):
        c1 = args['in_channel']
        c2 = args['channel']
        h1 = args['in_size'][0]
        h2 = args['featrue_size'][0]
        w2 = args['featrue_size'][1]

        self.pool_k = h1 // h2 if (h1 // h2) >= 2 else 1
        self.out_size = (h2, w2)
        self.compute_dtype = compute_dtype

        # deterministic init (PyTorch-default-style uniform bounds, fan_in=c1)
        k1, k2 = jax.random.split(key)
        bound = 1.0 / float(c1 ** 0.5)
        self.w = jax.random.uniform(k1, (c2, c1, 1, 1), jnp.float32, -bound, bound)
        self.b = jax.random.uniform(k2, (c2,), jnp.float32, -bound, bound)

    def __call__(self, x):
        return simple_align_pallas(x, self.w, self.b,
                                   pool_k=self.pool_k,
                                   out_size=self.out_size,
                                   compute_dtype=self.compute_dtype)


def _ref_forward(x, w_oihw, bias, pool_k, out_size):
    """Pure-JAX reference (lax conv + reduce_window / nearest gather)."""
    out = jax.lax.conv_general_dilated(
        x, w_oihw, window_strides=(1, 1), padding='VALID',
        dimension_numbers=('NCHW', 'OIHW', 'NCHW'))
    out = out + bias[None, :, None, None]
    if pool_k >= 2:
        out = jax.lax.reduce_window(
            out, -jnp.inf, jax.lax.max,
            (1, 1, pool_k, pool_k), (1, 1, pool_k, pool_k), 'VALID')
    else:
        th, tw = out_size
        H, W = out.shape[2], out.shape[3]
        ridx = (jnp.arange(th) * H) // th
        cidx = (jnp.arange(tw) * W) // tw
        out = out[:, :, ridx][:, :, :, cidx]
    return out


if __name__ == "__main__":
    key = jax.random.PRNGKey(0)
    k_m1, k_x1, k_m2, k_x2 = jax.random.split(key, 4)

    # --- pooling branch: in_size 32x32 -> featrue_size 16x16 (MaxPool2d k=2)
    args1 = dict(in_channel=4, channel=8, in_size=[32, 32], featrue_size=[16, 16])
    model1 = CompressorPallas(args1, k_m1)
    x1 = jax.random.normal(k_x1, (2, 4, 32, 32), jnp.float32)
    out1 = jax.block_until_ready(model1(x1))
    ref1 = _ref_forward(x1, model1.w, model1.b, model1.pool_k, model1.out_size)
    assert out1.shape == (2, 8, 16, 16)
    assert jnp.allclose(out1, ref1, rtol=1e-4, atol=1e-4)

    # --- upsample branch: in_size 8x8 -> featrue_size 16x16 (nearest)
    args2 = dict(in_channel=4, channel=8, in_size=[8, 8], featrue_size=[16, 16])
    model2 = CompressorPallas(args2, k_m2)
    x2 = jax.random.normal(k_x2, (2, 4, 8, 8), jnp.float32)
    out2 = jax.block_until_ready(model2(x2))
    ref2 = _ref_forward(x2, model2.w, model2.b, model2.pool_k, model2.out_size)
    assert out2.shape == (2, 8, 16, 16)
    assert jnp.allclose(out2, ref2, rtol=1e-4, atol=1e-4)

    # --- bf16 input/weight variant (halves DMA bytes; f32 accumulate inside)
    model3 = CompressorPallas(args1, k_m1, compute_dtype=jnp.bfloat16)
    out3 = jax.block_until_ready(model3(x1))
    assert out3.shape == (2, 8, 16, 16)
    assert jnp.allclose(out3, ref1, rtol=1e-1, atol=1e-1)

    print("KERNEL_OK")
</pallas_src>

<mosaic_0001>
module attributes {stable_mosaic.version = 11 : i64} {
  func.func @_pw_conv_phase_max_kernel(%arg0: i32, %arg1: memref<1x4x2048xf32, #tpu.memory_space<vmem>>, %arg2: memref<8x4xf32, #tpu.memory_space<vmem>>, %arg3: memref<8x1xf32, #tpu.memory_space<vmem>>, %arg4: memref<1x2x8x256xf32, #tpu.memory_space<vmem>>) attributes {dimension_semantics = [#tpu.dimension_semantics<parallel>], iteration_bounds = array<i64: 1>, scalar_prefetch = 0 : i64, scratch_operands = 0 : i64, tpu.core_type = #tpu.core_type<tc>, window_params = [{transform_indices = @transform_0, window_bounds = array<i64: 1, 4, 2048>}, {pipeline_mode = #tpu.pipeline_mode<synchronous>, transform_indices = @transform_1, window_bounds = array<i64: 8, 4>}, {pipeline_mode = #tpu.pipeline_mode<synchronous>, transform_indices = @transform_2, window_bounds = array<i64: 8, 1>}, {transform_indices = @transform_3, window_bounds = array<i64: 1, 2, 8, 256>}]} {
    %c0 = arith.constant 0 : index
    %c0_0 = arith.constant 0 : index
    %0 = vector.load %arg2[%c0, %c0_0] : memref<8x4xf32, #tpu.memory_space<vmem>>, vector<8x4xf32>
    %c0_1 = arith.constant 0 : index
    %c0_2 = arith.constant 0 : index
    %1 = vector.load %arg3[%c0_1, %c0_2] : memref<8x1xf32, #tpu.memory_space<vmem>>, vector<8x1xf32>
    %c0_3 = arith.constant 0 : index
    %c0_4 = arith.constant 0 : index
    %c0_5 = arith.constant 0 : index
    %2 = vector.load %arg1[%c0_3, %c0_4, %c0_5] : memref<1x4x2048xf32, #tpu.memory_space<vmem>>, vector<1x4x2048xf32>
    %3 = vector.shape_cast %2 : vector<1x4x2048xf32> to vector<4x2048xf32>
    %cst = arith.constant dense<0.000000e+00> : vector<8x2048xf32>
    %4 = tpu.matmul %0, %3, %cst {dimension_numbers = #tpu.dot_dimension_numbers<[1], [0], [0], [1], [0, 0, 1, 1], [], []>} : vector<8x4xf32>, vector<4x2048xf32>, vector<8x2048xf32> -> vector<8x2048xf32>
    %5 = vector.extract_strided_slice %4 {offsets = [0, 0], sizes = [8, 256], strides = [1, 1]} : vector<8x2048xf32> to vector<8x256xf32>
    %6 = vector.extract_strided_slice %4 {offsets = [0, 256], sizes = [8, 256], strides = [1, 1]} : vector<8x2048xf32> to vector<8x256xf32>
    %7 = arith.maximumf %5, %6 : vector<8x256xf32>
    %8 = vector.extract_strided_slice %4 {offsets = [0, 512], sizes = [8, 256], strides = [1, 1]} : vector<8x2048xf32> to vector<8x256xf32>
    %9 = arith.maximumf %7, %8 : vector<8x256xf32>
    %10 = vector.extract_strided_slice %4 {offsets = [0, 768], sizes = [8, 256], strides = [1, 1]} : vector<8x2048xf32> to vector<8x256xf32>
    %11 = arith.maximumf %9, %10 : vector<8x256xf32>
    %12 = vector.broadcast %1 : vector<8x1xf32> to vector<8x256xf32>
    %13 = arith.addf %11, %12 : vector<8x256xf32>
    %c0_6 = arith.constant 0 : index
    %c0_7 = arith.constant 0 : index
    %c0_8 = arith.constant 0 : index
    %c0_9 = arith.constant 0 : index
    %14 = vector.load %arg4[%c0_6, %c0_7, %c0_8, %c0_9] : memref<1x2x8x256xf32, #tpu.memory_space<vmem>>, vector<1x1x8x256xf32>
    %15 = vector.shape_cast %14 : vector<1x1x8x256xf32> to vector<8x256xf32>
    %16 = vector.shape_cast %13 : vector<8x256xf32> to vector<1x1x8x256xf32>
    tpu.vector_store %arg4[%c0_6, %c0_7, %c0_8, %c0_9], %16 {strides = array<i32>} : memref<1x2x8x256xf32, #tpu.memory_space<vmem>>, vector<1x1x8x256xf32>,
    %17 = vector.extract_strided_slice %4 {offsets = [0, 1024], sizes = [8, 256], strides = [1, 1]} : vector<8x2048xf32> to vector<8x256xf32>
    %18 = vector.extract_strided_slice %4 {offsets = [0, 1280], sizes = [8, 256], strides = [1, 1]} : vector<8x2048xf32> to vector<8x256xf32>
    %19 = arith.maximumf %17, %18 : vector<8x256xf32>
    %20 = vector.extract_strided_slice %4 {offsets = [0, 1536], sizes = [8, 256], strides = [1, 1]} : vector<8x2048xf32> to vector<8x256xf32>
    %21 = arith.maximumf %19, %20 : vector<8x256xf32>
    %22 = vector.extract_strided_slice %4 {offsets = [0, 1792], sizes = [8, 256], strides = [1, 1]} : vector<8x2048xf32> to vector<8x256xf32>
    %23 = arith.maximumf %21, %22 : vector<8x256xf32>
    %24 = vector.broadcast %1 : vector<8x1xf32> to vector<8x256xf32>
    %25 = arith.addf %23, %24 : vector<8x256xf32>
    %c0_10 = arith.constant 0 : index
    %c1 = arith.constant 1 : index
    %c0_11 = arith.constant 0 : index
    %c0_12 = arith.constant 0 : index
    %26 = vector.load %arg4[%c0_10, %c1, %c0_11, %c0_12] : memref<1x2x8x256xf32, #tpu.memory_space<vmem>>, vector<1x1x8x256xf32>
    %27 = vector.shape_cast %26 : vector<1x1x8x256xf32> to vector<8x256xf32>
    %28 = vector.shape_cast %25 : vector<8x256xf32> to vector<1x1x8x256xf32>
    tpu.vector_store %arg4[%c0_10, %c1, %c0_11, %c0_12], %28 {strides = array<i32>} : memref<1x2x8x256xf32, #tpu.memory_space<vmem>>, vector<1x1x8x256xf32>,
    return
  }
  func.func @transform_0(%arg0: i32) -> (i32, i32, i32) {
    %c0_i32 = arith.constant 0 : i32
    %c0_i32_0 = arith.constant 0 : i32
    %c0_i32_1 = arith.constant 0 : i32
    return %arg0, %c0_i32, %c0_i32_0 : i32, i32, i32
  }
  func.func @transform_1(%arg0: i32) -> (i32, i32) {
    %c0_i32 = arith.constant 0 : i32
    %c0_i32_0 = arith.constant 0 : i32
    %c0_i32_1 = arith.constant 0 : i32
    return %c0_i32, %c0_i32_0 : i32, i32
  }
  func.func @transform_2(%arg0: i32) -> (i32, i32) {
    %c0_i32 = arith.constant 0 : i32
    %c0_i32_0 = arith.constant 0 : i32
    %c0_i32_1 = arith.constant 0 : i32
    return %c0_i32, %c0_i32_0 : i32, i32
  }
  func.func @transform_3(%arg0: i32) -> (i32, i32, i32, i32) {
    %c0_i32 = arith.constant 0 : i32
    %c0_i32_0 = arith.constant 0 : i32
    %c0_i32_1 = arith.constant 0 : i32
    %c0_i32_2 = arith.constant 0 : i32
    return %arg0, %c0_i32, %c0_i32_0, %c0_i32_1 : i32, i32, i32, i32
  }
}

</mosaic_0001>

<bundles_post_ra>
// kernel: simple_align_pallas.1
= control target key start
LH: loop header
LB: loop body
LE: loop exit
PB: predicated region body
PF: predicated region fallthrough
CT: control target
= control target key end

     0   :  { %vm44_vm0 = vcmask 1043456   ;;  %v712_v2 = vmov 0.0   ;;  %v713_v7 = vmov 0   ;;  %vm40_vm1 = vcmask 31744   ;;  %s800_s0 = inlined_call_operand.vmem [shape: f32[1,4,2048], index: 0, kind: input, shape index: {}]   ;;  %s801_s1 = inlined_call_operand.vmem [shape: f32[8,4], index: 1, kind: input, shape index: {}]   ;;  %s802_s2 = inlined_call_operand.vmem [shape: f32[8,1], index: 2, kind: input, shape index: {}]   ;;  %s803_s3 = inlined_call_operand.vmem [shape: f32[1,2,8,256], index: 3, kind: output, shape index: {}]  }
   0x1   :  { %v16_v0 = vld [vmem:[%s800_s0] sm:$0xff]  ;;  %v17_v1 = vld [vmem:[%s800_s0 + $0x8] sm:$0xff]  ;;  %141 = vmatprep.mubr.f32.mxu0 %v712_v2  ;;  %212 = vmatprep.mubr.f32.mxu1 %v712_v2  ;;  %v18_v5 = vld [vmem:[%s800_s0 + $0x10] sm:$0xff] }
   0x2   :  { %v32_v3 = vcombine.high %v16_v0, %v16_v0  ;;  %v33_v4 = vcombine.high %v17_v1, %v17_v1  ;;  %v19_v6 = vld [vmem:[%s800_s0 + $0x18] sm:$0xff]  ;;  %703 = vset.pattern.permute.xlu0 %v713_v7  ;;  %v14_v8 = vld [vmem:[%s801_s1] sm:$0xff]  ;;  %v34_v9 = vcombine.high %v18_v5, %v18_v5  ;;  %v21_v12 = vld [vmem:[%s800_s0 + $0x28] sm:$0xff] }
   0x3   :  { %v35_v10 = vcombine.high %v19_v6, %v19_v6  ;;  %v20_v11 = vld [vmem:[%s800_s0 + $0x20] sm:$0xff]  ;;  %v37_v14 = vcombine.high %v21_v12, %v21_v12  ;;  %v22_v15 = vld [vmem:[%s800_s0 + $0x30] sm:$0xff]  ;;  %v23_v16 = vld [vmem:[%s800_s0 + $0x38] sm:$0xff] }
   0x4   :  { %675 = vmatprep.subr.msk.mxu0 %vm44_vm0, %v32_v3  ;;  %678 = vmatprep.subr.msk.mxu1 %vm44_vm0, %v33_v4  ;;  %v36_v13 = vcombine.high %v20_v11, %v20_v11  ;;  %v38_v17 = vcombine.high %v22_v15, %v22_v15  ;;  %v39_v18 = vcombine.high %v23_v16, %v23_v16  ;;  %v15_v19 = vld [vmem:[%s802_s2] sm:$0xff] }
   0x5   :  { %676 = vmatpush1.msk.msra.mxu0 %vm44_vm0, %v16_v0  ;;  %679 = vmatpush1.msk.msra.mxu1 %vm44_vm0, %v17_v1 }
   0x6   :  { %677 = vmatmul.mubr.msk.f32.vlgmr.msra.gmra.mrb[0].mxu0 %vm40_vm1, %v14_v8  ;;  %680 = vmatmul.mubr.msk.f32.vlgmr.msra.gmra.mrb[0].mxu1 %vm40_vm1, %v14_v8 }
   0x7   :  { %681 = vmatprep.subr.msk.mxu0 %vm44_vm0, %v34_v9  ;;  %684 = vmatprep.subr.msk.mxu1 %vm44_vm0, %v35_v10 }
   0x8   :  { %682 = vmatpush1.msk.msra.mxu0 %vm44_vm0, %v18_v5  ;;  %283 = vmatprep.mubr.f32.mxu0 %v712_v2 }
   0x9   :  { %685 = vmatpush1.msk.msra.mxu1 %vm44_vm0, %v19_v6  ;;  %354 = vmatprep.mubr.f32.mxu1 %v712_v2 }
   0xa   :  { %683 = vmatmul.mubr.msk.f32.vlgmr.msra.gmra.mrb[2].mxu0 %vm40_vm1, %v14_v8  ;;  %686 = vmatmul.mubr.msk.f32.vlgmr.msra.gmra.mrb[2].mxu1 %vm40_vm1, %v14_v8 }
   0xb   :  { %687 = vmatprep.subr.msk.mxu0 %vm44_vm0, %v36_v13  ;;  %690 = vmatprep.subr.msk.mxu1 %vm44_vm0, %v37_v14 }
   0xc   :  { %688 = vmatpush1.msk.msra.mxu0 %vm44_vm0, %v20_v11  ;;  %425 = vmatprep.mubr.f32.mxu0 %v712_v2 }
   0xd   :  { %691 = vmatpush1.msk.msra.mxu1 %vm44_vm0, %v21_v12  ;;  %496 = vmatprep.mubr.f32.mxu1 %v712_v2 }
   0xe   :  { %689 = vmatmul.mubr.msk.f32.vlgmr.msra.gmra.mrb[4].mxu0 %vm40_vm1, %v14_v8  ;;  %692 = vmatmul.mubr.msk.f32.vlgmr.msra.gmra.mrb[4].mxu1 %vm40_vm1, %v14_v8 }
   0xf   :  { %693 = vmatprep.subr.msk.mxu0 %vm44_vm0, %v38_v17  ;;  %696 = vmatprep.subr.msk.mxu1 %vm44_vm0, %v39_v18 }
  0x10   :  { %694 = vmatpush1.msk.msra.mxu0 %vm44_vm0, %v22_v15  ;;  %567 = vmatprep.mubr.f32.mxu0 %v712_v2 }
  0x11   :  { %697 = vmatpush1.msk.msra.mxu1 %vm44_vm0, %v23_v16  ;;  %638 = vmatprep.mubr.f32.mxu1 %v712_v2 }
  0x12   :  { %695 = vmatmul.mubr.msk.f32.vlgmr.msra.gmra.mrb[6].mxu0 %vm40_vm1, %v14_v8  ;;  %698 = vmatmul.mubr.msk.f32.vlgmr.msra.gmra.mrb[6].mxu1 %vm40_vm1, %v14_v8 }
  0x13   :  { %653 = vperm.xlu0 %703, %v15_v19  }
  0x92   :  { %v654_v32 = vpop.permute.xlu0 %653 }
  0xd9   :  { %v143_v20 = vpop.f32.mrb[0].mxu0  ;;  %v214_v21 = vpop.f32.mrb[0].mxu1 }
  0xda   :  { %v645_v22 = vmax.f32 %v143_v20, %v214_v21  ;;  %v145_v23 = vpop.f32.mrb[1].mxu0  ;;  %v216_v24 = vpop.f32.mrb[1].mxu1 }
  0xdb   :  { %v646_v25 = vmax.f32 %v145_v23, %v216_v24 }
  0xdd   :  { %v285_v26 = vpop.f32.mrb[2].mxu0  ;;  %v356_v27 = vpop.f32.mrb[2].mxu1 }
  0xde   :  { %v647_v28 = vmax.f32 %v645_v22, %v285_v26  ;;  %v287_v29 = vpop.f32.mrb[3].mxu0  ;;  %v358_v30 = vpop.f32.mrb[3].mxu1 }
  0xdf   :  { %v648_v31 = vmax.f32 %v646_v25, %v287_v29 }
  0xe0   :  { %v649_v33 = vmax.f32 %v647_v28, %v356_v27 }
  0xe1   :  { %v650_v34 = vmax.f32 %v648_v31, %v358_v30  ;;  %v427_v35 = vpop.f32.mrb[4].mxu0  ;;  %v498_v36 = vpop.f32.mrb[4].mxu1 }
  0xe2   :  { %v656_v37 = vadd.f32 %v654_v32, %v649_v33  ;;  %v660_v38 = vmax.f32 %v427_v35, %v498_v36  ;;  %v429_v39 = vpop.f32.mrb[5].mxu0  ;;  %v500_v40 = vpop.f32.mrb[5].mxu1 }
  0xe3   :  { %v657_v41 = vadd.f32 %v654_v32, %v650_v34  ;;  %v661_v42 = vmax.f32 %v429_v39, %v500_v40 }
  0xe4   :  { %658 = vst [vmem:[%s803_s3] sm:$0xff] %v656_v37 }
  0xe5   :  { %659 = vst [vmem:[%s803_s3 + $0x8] sm:$0xff] %v657_v41  ;;  %v569_v43 = vpop.f32.mrb[6].mxu0  ;;  %v640_v44 = vpop.f32.mrb[6].mxu1 }
  0xe6   :  { %v662_v45 = vmax.f32 %v660_v38, %v569_v43  ;;  %v571_v46 = vpop.f32.mrb[7].mxu0  ;;  %v642_v47 = vpop.f32.mrb[7].mxu1 }
  0xe7   :  { %v663_v48 = vmax.f32 %v661_v42, %v571_v46 }
  0xe8   :  { %v664_v49 = vmax.f32 %v662_v45, %v640_v44 }
  0xe9   :  { %v665_v50 = vmax.f32 %v663_v48, %v642_v47 }
  0xea   :  { %v666_v51 = vadd.f32 %v664_v49, %v654_v32 }
  0xeb   :  { %v667_v52 = vadd.f32 %v665_v50, %v654_v32 }
  0xec   :  { %699 = vst [vmem:[%s803_s3 + $0x10] sm:$0xff] %v666_v51 }
  0xed   :  { %700 = vst [vmem:[%s803_s3 + $0x18] sm:$0xff] %v667_v52 }

</bundles_post_ra>
